<compile_context>
chip_gen: v6e
topology: v6e:2x2x1
jax: 0.10.0
libtpu: 0.0.40
codegen_flags: <defaults>
</compile_context>

<pallas_src>
import functools

import jax
import jax.numpy as jnp
from jax.experimental import pallas as pl
from jax.experimental.pallas import tpu as pltpu

LANE = 128
MAX_TILE = 2048  # lanes per grid step; keeps operand vreg count / VMEM modest


def _round_up(x, m):
    return (x + m - 1) // m * m


def _ccm_kernel(x_ref, w1_ref, b1_ref, w2_ref, b2_ref, o_ref, *, w_pad, tile, winw):
    # x_ref : (1, Cin_p, Ltot)  halo-padded, spatially-flattened NCHW image
    # w1_ref: (Chid, 9*Cin_p)   3x3 weights, tap-major K (t = kh*3+kw, chan innermost)
    # b1_ref: (Chid, 1)
    # w2_ref: (Cout, Chid)      1x1 weights
    # b2_ref: (Cout, 1)
    # o_ref : (1, Cout, TILE)   lane-dense output tile over the padded-flat axis
    k = pl.program_id(1)
    start = pl.multiple_of(k * tile, LANE)  # tile is a multiple of 128

    # One aligned window load; every tap is a static lane slice of it, so the
    # im2col operand never leaves vregs (no scratch round trip).
    window = x_ref[0, :, pl.ds(start, winw)]            # (Cin_p, WINW)

    taps = []
    for kh in range(3):
        for kw in range(3):
            off = kh * w_pad + kw                        # tap offset incl. left halo
            taps.append(window[:, off:off + tile])       # (Cin_p, TILE) full-vreg rows
    patch = jnp.concatenate(taps, axis=0)                # (9*Cin_p, TILE), in vregs

    # 3x3 conv as a single K = 9*Cin_p matmul (accumulation stays inside the MXU).
    h = jnp.dot(w1_ref[...], patch, preferred_element_type=jnp.float32)
    h = h + b1_ref[...].astype(jnp.float32)              # (Chid, TILE)

    # Exact (erf) GELU — matches torch.nn.GELU() default numerics.
    h = h * 0.5 * (1.0 + jax.lax.erf(h * jnp.float32(0.7071067811865476)))

    # 1x1 conv: (Cout, Chid) @ (Chid, TILE).  h stays f32 (jnp.dot promotes),
    # so lower-precision weights never silently downcast the activations.
    y = jnp.dot(w2_ref[...], h, preferred_element_type=jnp.float32)
    y = y + b2_ref[...].astype(jnp.float32)              # (Cout, TILE)

    # Note: padded-border / flat-wraparound positions are computed here but are
    # cropped away by the wrapper's final [:, :, 1:H+1, 1:W+1] slice.
    o_ref[...] = y.reshape(o_ref.shape).astype(o_ref.dtype)


def ccm_forward(x_nchw, w1, b1, w2, b2):
    """CCM forward.

    x_nchw: (B, Cin, H, W)     -- PyTorch NCHW input (kept NCHW throughout)
    w1:     (Chid, Cin, 3, 3)  -- conv3x3 weight (PyTorch layout)
    b1:     (Chid,)
    w2:     (Cout, Chid)       -- conv1x1 weight (kernel dims squeezed)
    b2:     (Cout,)
    returns (B, Cout, H, W)
    """
    B, Cin, H, W = x_nchw.shape
    Chid = w1.shape[0]
    Cout = w2.shape[0]

    itemsize = jnp.dtype(x_nchw.dtype).itemsize
    sub = max(8, 32 // max(itemsize, 1))     # sublane tile rows (8 for f32, 16 bf16)
    cin_p = _round_up(Cin, sub)              # full-vreg im2col pieces -> aligned concat

    w_pad = W + 2                            # padded row width
    lp = (H + 2) * w_pad                     # flattened padded-spatial length
    halo = w_pad + 1                         # max |tap offset| around the centre

    # Fat lane tile: whole padded image per grid step when it fits.
    tile = min(_round_up(lp, LANE), MAX_TILE)
    ntiles = pl.cdiv(lp, tile)
    winw = tile + 2 * halo                   # per-step window (tile + both halos)
    ltot = (ntiles - 1) * tile + winw        # minimal flat padding (no lane rounding)

    # conv padding=1 -> spatial zero pad; pad channels to cin_p; flatten H/W and
    # add the flat halo.  All layout-free in XLA (no NCHW<->NHWC transposes).
    xpad = jnp.pad(x_nchw, ((0, 0), (0, cin_p - Cin), (1, 1), (1, 1)))
    xflat = xpad.reshape(B, cin_p, lp)
    xflat = jnp.pad(xflat, ((0, 0), (0, 0), (halo, ltot - lp - halo)))

    # (Chid, Cin, 3, 3) -> pad Cin -> (Chid, 3, 3, Cin_p) -> (Chid, 9*Cin_p):
    # tap-major K ordering matching the in-kernel im2col (t = kh*3+kw, chan innermost).
    w1p = jnp.pad(w1, ((0, 0), (0, cin_p - Cin), (0, 0), (0, 0)))
    w1k = jnp.transpose(w1p, (0, 2, 3, 1)).reshape(Chid, 9 * cin_p)
    b1k = b1.reshape(Chid, 1)
    w2k = w2.reshape(Cout, Chid)
    b2k = b2.reshape(Cout, 1)

    kernel = functools.partial(_ccm_kernel, w_pad=w_pad, tile=tile, winw=winw)

    # VMEM budget guard (mostly for v7x's 64 MiB): per-batch image block is
    # double-buffered across the batch grid axis.
    est_vmem = (
        2 * cin_p * ltot * itemsize                      # x block, double-buffered
        + 2 * Cout * tile * itemsize                     # output block, double-buffered
        + 2 * (Chid * 9 * cin_p + Chid + Cout * Chid + Cout) * itemsize
        + (9 * cin_p + 2 * Chid + Cout) * tile * 4       # live f32 values (patch/h/y)
    )
    cp_kwargs = dict(dimension_semantics=("parallel", "parallel"))
    if est_vmem > 24 * 1024 * 1024:
        # TODO(synk): for very large Cin*H*W, tile the flat axis with a halo in
        # the x BlockSpec instead of revisiting the whole image per batch.
        cp_kwargs["vmem_limit_bytes"] = min(int(est_vmem * 5 // 4), 60 * 1024 * 1024)

    out_flat = pl.pallas_call(
        kernel,
        out_shape=jax.ShapeDtypeStruct((B, Cout, ntiles * tile), x_nchw.dtype),
        grid_spec=pltpu.PrefetchScalarGridSpec(
            num_scalar_prefetch=0,
            grid=(B, ntiles),
            in_specs=[
                # Per-batch image block; constant across the inner lane-tile axis
                # -> fetched once per batch and revisited.
                pl.BlockSpec((1, cin_p, ltot), lambda b, k: (b, 0, 0)),
                # Grid-invariant weights/biases (constant index_map -> resident).
                pl.BlockSpec((Chid, 9 * cin_p), lambda b, k: (0, 0)),
                pl.BlockSpec((Chid, 1), lambda b, k: (0, 0)),
                pl.BlockSpec((Cout, Chid), lambda b, k: (0, 0)),
                pl.BlockSpec((Cout, 1), lambda b, k: (0, 0)),
            ],
            out_specs=pl.BlockSpec((1, Cout, tile), lambda b, k: (b, 0, k)),
        ),
        compiler_params=pltpu.CompilerParams(**cp_kwargs),
    )(xflat, w1k, b1k, w2k, b2k)

    # Drop the flat padding and the spatial halo (cheap XLA slice; the reshape
    # back to NCHW spatial dims is layout-free).
    out = out_flat[:, :, :lp].reshape(B, Cout, H + 2, W + 2)
    return out[:, :, 1:H + 1, 1:W + 1]


def ccm_reference(x_nchw, w1, b1, w2, b2):
    """Pure-JAX reference (XLA conv) for correctness check."""
    y = jax.lax.conv_general_dilated(
        x_nchw.astype(jnp.float32), w1.astype(jnp.float32),
        window_strides=(1, 1), padding=((1, 1), (1, 1)),
        dimension_numbers=("NCHW", "OIHW", "NCHW"))
    y = y + b1.reshape(1, -1, 1, 1)
    y = jax.nn.gelu(y, approximate=False)
    z = jax.lax.conv_general_dilated(
        y, w2[:, :, None, None].astype(jnp.float32),
        window_strides=(1, 1), padding=((0, 0), (0, 0)),
        dimension_numbers=("NCHW", "OIHW", "NCHW"))
    z = z + b2.reshape(1, -1, 1, 1)
    return z.astype(x_nchw.dtype)


if __name__ == "__main__":
    # CCM(dim=4, ffn_scale=1.5) -> hidden_dim = int(4 * 1.5) = 6
    B, dim, H, W = 2, 4, 16, 16
    hidden_dim = int(dim * 1.5)

    key = jax.random.PRNGKey(0)
    kx, kw1, kb1, kw2, kb2 = jax.random.split(key, 5)

    x = jax.random.normal(kx, (B, dim, H, W), dtype=jnp.float32)
    w1 = jax.random.normal(kw1, (hidden_dim, dim, 3, 3), dtype=jnp.float32) * 0.1
    b1 = jax.random.normal(kb1, (hidden_dim,), dtype=jnp.float32) * 0.1
    w2 = jax.random.normal(kw2, (dim, hidden_dim), dtype=jnp.float32) * 0.1
    b2 = jax.random.normal(kb2, (dim,), dtype=jnp.float32) * 0.1

    out = jax.block_until_ready(ccm_forward(x, w1, b1, w2, b2))
    ref = jax.block_until_ready(ccm_reference(x, w1, b1, w2, b2))

    assert out.shape == (B, dim, H, W), out.shape
    assert jnp.allclose(out, ref, atol=1e-4, rtol=1e-4), (
        float(jnp.max(jnp.abs(out - ref))))
    print("KERNEL_OK")
</pallas_src>

<mosaic_0001>
module attributes {stable_mosaic.version = 11 : i64} {
  func.func @_ccm_kernel(%arg0: i32, %arg1: i32, %arg2: memref<1x8x422xf32, #tpu.memory_space<vmem>>, %arg3: memref<6x72xf32, #tpu.memory_space<vmem>>, %arg4: memref<6x1xf32, #tpu.memory_space<vmem>>, %arg5: memref<4x6xf32, #tpu.memory_space<vmem>>, %arg6: memref<4x1xf32, #tpu.memory_space<vmem>>, %arg7: memref<1x4x384xf32, #tpu.memory_space<vmem>>) attributes {dimension_semantics = [#tpu.dimension_semantics<parallel>, #tpu.dimension_semantics<parallel>], iteration_bounds = array<i64: 2, 1>, scalar_prefetch = 0 : i64, scratch_operands = 0 : i64, tpu.core_type = #tpu.core_type<tc>, window_params = [{transform_indices = @transform_0, window_bounds = array<i64: 1, 8, 422>}, {pipeline_mode = #tpu.pipeline_mode<synchronous>, transform_indices = @transform_1, window_bounds = array<i64: 6, 72>}, {pipeline_mode = #tpu.pipeline_mode<synchronous>, transform_indices = @transform_2, window_bounds = array<i64: 6, 1>}, {pipeline_mode = #tpu.pipeline_mode<synchronous>, transform_indices = @transform_3, window_bounds = array<i64: 4, 6>}, {pipeline_mode = #tpu.pipeline_mode<synchronous>, transform_indices = @transform_4, window_bounds = array<i64: 4, 1>}, {transform_indices = @transform_5, window_bounds = array<i64: 1, 4, 384>}]} {
    %c384_i32 = arith.constant 384 : i32
    %0 = arith.muli %arg1, %c384_i32 : i32
    %1 = tpu.assume_multiple %0, 128 : i32
    %c0 = arith.constant 0 : index
    %c0_0 = arith.constant 0 : index
    %2 = arith.index_cast %1 : i32 to index
    %3 = vector.load %arg2[%c0, %c0_0, %2] : memref<1x8x422xf32, #tpu.memory_space<vmem>>, vector<1x8x422xf32>
    %4 = vector.shape_cast %3 : vector<1x8x422xf32> to vector<8x422xf32>
    %5 = vector.extract_strided_slice %4 {offsets = [0, 0], sizes = [8, 384], strides = [1, 1]} : vector<8x422xf32> to vector<8x384xf32>
    %6 = vector.extract_strided_slice %4 {offsets = [0, 1], sizes = [8, 384], strides = [1, 1]} : vector<8x422xf32> to vector<8x384xf32>
    %7 = vector.extract_strided_slice %4 {offsets = [0, 2], sizes = [8, 384], strides = [1, 1]} : vector<8x422xf32> to vector<8x384xf32>
    %8 = vector.extract_strided_slice %4 {offsets = [0, 18], sizes = [8, 384], strides = [1, 1]} : vector<8x422xf32> to vector<8x384xf32>
    %9 = vector.extract_strided_slice %4 {offsets = [0, 19], sizes = [8, 384], strides = [1, 1]} : vector<8x422xf32> to vector<8x384xf32>
    %10 = vector.extract_strided_slice %4 {offsets = [0, 20], sizes = [8, 384], strides = [1, 1]} : vector<8x422xf32> to vector<8x384xf32>
    %11 = vector.extract_strided_slice %4 {offsets = [0, 36], sizes = [8, 384], strides = [1, 1]} : vector<8x422xf32> to vector<8x384xf32>
    %12 = vector.extract_strided_slice %4 {offsets = [0, 37], sizes = [8, 384], strides = [1, 1]} : vector<8x422xf32> to vector<8x384xf32>
    %13 = vector.extract_strided_slice %4 {offsets = [0, 38], sizes = [8, 384], strides = [1, 1]} : vector<8x422xf32> to vector<8x384xf32>
    %14 = tpu.concatenate %5, %6, %7, %8, %9, %10, %11, %12, %13 in 0 : vector<8x384xf32>, vector<8x384xf32>, vector<8x384xf32>, vector<8x384xf32>, vector<8x384xf32>, vector<8x384xf32>, vector<8x384xf32>, vector<8x384xf32>, vector<8x384xf32> -> vector<72x384xf32>
    %c0_1 = arith.constant 0 : index
    %c0_2 = arith.constant 0 : index
    %15 = vector.load %arg3[%c0_1, %c0_2] : memref<6x72xf32, #tpu.memory_space<vmem>>, vector<6x72xf32>
    %cst = arith.constant dense<0.000000e+00> : vector<6x384xf32>
    %16 = tpu.matmul %15, %14, %cst {dimension_numbers = #tpu.dot_dimension_numbers<[1], [0], [0], [1], [0, 0, 1, 1], [], []>} : vector<6x72xf32>, vector<72x384xf32>, vector<6x384xf32> -> vector<6x384xf32>
    %c0_3 = arith.constant 0 : index
    %c0_4 = arith.constant 0 : index
    %17 = vector.load %arg4[%c0_3, %c0_4] : memref<6x1xf32, #tpu.memory_space<vmem>>, vector<6x1xf32>
    %18 = vector.broadcast %17 : vector<6x1xf32> to vector<6x384xf32>
    %19 = arith.addf %16, %18 : vector<6x384xf32>
    %cst_5 = arith.constant 5.000000e-01 : f32
    %20 = vector.broadcast %cst_5 : f32 to vector<6x384xf32>
    %21 = arith.mulf %19, %20 : vector<6x384xf32>
    %cst_6 = arith.constant 0.707106769 : f32
    %22 = vector.broadcast %cst_6 : f32 to vector<6x384xf32>
    %23 = arith.mulf %19, %22 : vector<6x384xf32>
    %24 = math.erf %23 : vector<6x384xf32>
    %cst_7 = arith.constant 1.000000e+00 : f32
    %25 = vector.broadcast %cst_7 : f32 to vector<6x384xf32>
    %26 = arith.addf %25, %24 : vector<6x384xf32>
    %27 = arith.mulf %21, %26 : vector<6x384xf32>
    %c0_8 = arith.constant 0 : index
    %c0_9 = arith.constant 0 : index
    %28 = vector.load %arg5[%c0_8, %c0_9] : memref<4x6xf32, #tpu.memory_space<vmem>>, vector<4x6xf32>
    %cst_10 = arith.constant dense<0.000000e+00> : vector<4x384xf32>
    %29 = tpu.matmul %28, %27, %cst_10 {dimension_numbers = #tpu.dot_dimension_numbers<[1], [0], [0], [1], [0, 0, 1, 1], [], []>} : vector<4x6xf32>, vector<6x384xf32>, vector<4x384xf32> -> vector<4x384xf32>
    %c0_11 = arith.constant 0 : index
    %c0_12 = arith.constant 0 : index
    %30 = vector.load %arg6[%c0_11, %c0_12] : memref<4x1xf32, #tpu.memory_space<vmem>>, vector<4x1xf32>
    %31 = vector.broadcast %30 : vector<4x1xf32> to vector<4x384xf32>
    %32 = arith.addf %29, %31 : vector<4x384xf32>
    %33 = vector.shape_cast %32 : vector<4x384xf32> to vector<1x4x384xf32>
    %c0_13 = arith.constant 0 : index
    %c0_14 = arith.constant 0 : index
    %c0_15 = arith.constant 0 : index
    %34 = vector.load %arg7[%c0_13, %c0_14, %c0_15] : memref<1x4x384xf32, #tpu.memory_space<vmem>>, vector<1x4x384xf32>
    tpu.vector_store %arg7[%c0_13, %c0_14, %c0_15], %33 {strides = array<i32>} : memref<1x4x384xf32, #tpu.memory_space<vmem>>, vector<1x4x384xf32>,
    return
  }
  func.func @transform_0(%arg0: i32, %arg1: i32) -> (i32, i32, i32) {
    %c0_i32 = arith.constant 0 : i32
    %c0_i32_0 = arith.constant 0 : i32
    %c0_i32_1 = arith.constant 0 : i32
    return %arg0, %c0_i32, %c0_i32_0 : i32, i32, i32
  }
  func.func @transform_1(%arg0: i32, %arg1: i32) -> (i32, i32) {
    %c0_i32 = arith.constant 0 : i32
    %c0_i32_0 = arith.constant 0 : i32
    %c0_i32_1 = arith.constant 0 : i32
    return %c0_i32, %c0_i32_0 : i32, i32
  }
  func.func @transform_2(%arg0: i32, %arg1: i32) -> (i32, i32) {
    %c0_i32 = arith.constant 0 : i32
    %c0_i32_0 = arith.constant 0 : i32
    %c0_i32_1 = arith.constant 0 : i32
    return %c0_i32, %c0_i32_0 : i32, i32
  }
  func.func @transform_3(%arg0: i32, %arg1: i32) -> (i32, i32) {
    %c0_i32 = arith.constant 0 : i32
    %c0_i32_0 = arith.constant 0 : i32
    %c0_i32_1 = arith.constant 0 : i32
    return %c0_i32, %c0_i32_0 : i32, i32
  }
  func.func @transform_4(%arg0: i32, %arg1: i32) -> (i32, i32) {
    %c0_i32 = arith.constant 0 : i32
    %c0_i32_0 = arith.constant 0 : i32
    %c0_i32_1 = arith.constant 0 : i32
    return %c0_i32, %c0_i32_0 : i32, i32
  }
  func.func @transform_5(%arg0: i32, %arg1: i32) -> (i32, i32, i32) {
    %c0_i32 = arith.constant 0 : i32
    %c0_i32_0 = arith.constant 0 : i32
    return %arg0, %c0_i32, %arg1 : i32, i32, i32
  }
}

</mosaic_0001>

<bundles_post_ra>
// kernel: tpu_custom_call.1
= control target key start
LH: loop header
LB: loop body
LE: loop exit
PB: predicated region body
PF: predicated region fallthrough
CT: control target
= control target key end

     0   :  { %10 = vsyncpa [#allocation3], 0  ;;  %s1346_s0 = inlined_call_operand.hbm [shape: f32[2,8,422], index: 0, kind: input, shape index: {}]   ;;  %s1347_s1 = inlined_call_operand.vmem [shape: f32[6,72], index: 1, kind: input, shape index: {}]   ;;  %s1348_s2 = inlined_call_operand.vmem [shape: f32[6,1], index: 2, kind: input, shape index: {}]   ;;  %s1349_s3 = inlined_call_operand.vmem [shape: f32[4,6], index: 3, kind: input, shape index: {}]   ;;  %s1350_s4 = inlined_call_operand.vmem [shape: f32[4,1], index: 4, kind: input, shape index: {}]   ;;  %s1351_s5 = inlined_call_operand.hbm [shape: f32[2,4,384], index: 5, kind: output, shape index: {}]  }
   0x1   :  { %12 = vsyncpa [#allocation3 + $0x1], 0 }
   0x2   :  { %13 = vsyncpa [#allocation4], 0 }
   0x3   :  { %15 = vsyncpa [#allocation4 + $0x1], 0  ;;  %s1118_s18 = smov 0   ;;  %s1120_s19 = smov 0  }
   0x4   :  { %s1122_s20 = smov 0   ;;  %s1124_s21 = smov 0  }
   0x5   :  { %s1126_s22 = smov 0   ;;  %s1128_s23 = smov 0  }
   0x6 LB: > { %s824_s24 = sadd.s32 4294967295, %s1073_s23   ;;  %s825_s25 = sadd.s32 4294967294, %s1073_s23   ;;  %s1073_s23 = sphi %s1128_s23, %s21_s23   ;;  %s1069_s22 = sphi %s1126_s22, %s1363_s22   ;;  %s1065_s21 = sphi %s1124_s21, %s1362_s21   ;;  %s1061_s20 = sphi %s1122_s20, %s1361_s20   ;;  %s1057_s19 = sphi %s1120_s19, %s1360_s19   ;;  %s1053_s18 = sphi %s1118_s18, %s1359_s18  }
   0x7   : > { %s33_s26 = sadd.s32 1, %s1069_s22  ;;  %s40_s27 = sadd.s32 1, %s1061_s20 }
   0x8   : > { %p35_p0 = scmp.ge.s32.totalorder %s33_s26, 2  ;;  %p47_p1 = scmp.ne.s32.totalorder %s1061_s20, %s1057_s19 }
   0x9   : > { %p48_p2 = scmp.eq.s32.totalorder %s1073_s23, 0  ;;  %p53_p3 = scmp.ne.s32.totalorder %s1057_s19, %s1053_s18 }
   0xa   : > { %s1365_s26 = smov (%p35_p0, %s33_s26), 0  ;;  %p54_p5 = scmp.eq.s32.totalorder %s824_s24, 0 }
   0xb   : > { %p1159_p4 = por %p48_p2, %p47_p1  ;;  %s37_s29 = ssub.s32 %s1069_s22, %s1365_s26 }
   0xc   : > { %p163_p6 = scmp.eq.s32.totalorder %s824_s24, 1  ;;  %p38_p7 = scmp.eq.s32.totalorder %s37_s29, 0 }
   0xd   : > { %p1165_p8 = por %p54_p5, %p53_p3  ;;  %p169_p10 = scmp.eq.s32.totalorder %s825_s25, 1 }
   0xe   : > { %p1169_p9 = por %p163_p6, %p47_p1  ;;  %p896_p13 = scmp.lt.s32.totalorder %s1073_s23, 2 }
   0xf   : > { %s1174_s7 = scalar_select %p38_p7, %s1061_s20, %s40_s27  }
  0x10   : > { %p1176_p11 = por %p169_p10, %p53_p3  ;;  %s201_s9 = sand.u32 1, %s1061_s20  }
  0x11   : > { %s828_s10 = sshll.u32 %s201_s9, 5  ;;  %s843_s11 = sshll.u32 %s1069_s22, 9 }
  0x12   : > { %s1355_s8 = scalar_select %p1176_p11, 1, 0 }
  0x13   : > { %s211_s14 = scalar_lea.hbm %s1346_s0, %s843_s11  ;;  %s205_s15 = scalar_lea.vmem [#allocation2], %s828_s10 }
  0x14   : > { %s213_s16 = sshll.u32 %s205_s15, 4  ;;  %p1189_p0 = pnand %p896_p13, %p1159_p4  ;;  %s214_s16 = int_to_ptr.vmem [resolvable:$true] %s213_s16 }
  0x15   : > { %p831_p1 = scmp.ge.s32.totalorder %s1073_s23, 1  ;;  %p218_p2 = scmp.lt.s32.totalorder %s1073_s23, 3 }
  0x16   : > { %s202_s24 = scalar_lea.sflag [#allocation3], %s201_s9  ;;  %p967_p3 = pneg %p1189_p0 }
  0x17   : > { %s978_s25 = scalar_lea.vmem %s214_s16, 512  ;;  %s1075_s27 = smov [#allocation2]  }
  0x18   : > { %p979_p5 = scmp.ne.s32.totalorder %s214_s16, %s978_s25  ;;  %s983_s29 = sshll.u32 %s1075_s27, 4  ;;  %s984_s29 = int_to_ptr.vmem [resolvable:$false] %s983_s29 }
  0x19   : > { %s985_s10 = scalar_lea.vmem %s984_s29, 1024  ;;  %p986_p10 = scmp.lt.s32.totalorder %s214_s16, %s984_s29 }
  0x1a   : > { %p981_p6 = pnand %p979_p5, %p967_p3  ;;  %p987_p12 = scmp.lt.s32.totalorder %s985_s10, %s978_s25 }
  0x1c   : > { %p982_p7 = pneg %p981_p6  ;;  %p988_p4 = por %p987_p12, %p986_p10 }
  0x1e   : > { %p989_p13 = pnand %p988_p4, %p982_p7 }
  0x20   : > { %992 = shalt.err (!%p989_p13)
}
  0x21   : > { %891 = dma.hbm_to_vmem [thread:$0]  (!%p1189_p0), %s211_s14, 512, %s214_s16, %s202_s24  }
  0x22   : > { %p219_p11 = pnand %p831_p1, %p218_p2 }
  0x23   : > { %s1204_s28 = sand.u32 (!%p219_p11), 1, %s1057_s19  }
  0x24   : > { %222 = sbr.rel (%p219_p11) target bundleno = 648 (0x288), region = 40  ;;  %s832_s9 = sshll.u32 (!%p219_p11), %s1204_s28, 5 }
  0x25   : > { %s225_s11 = scalar_lea.sflag (!%p219_p11), [#allocation3], %s1204_s28  ;;  %s228_s12 = scalar_lea.vmem (!%p219_p11), [#allocation2], %s832_s9 }
  0x29   : > { %1044 = dma.done.wait (%p1165_p8), %s225_s11, 512  }
  0x2a   : > { %1046 = vsyncadd (%p1165_p8), %s225_s11, 4294966784  ;;  %v1212_v0 = vld [vmem:[%s228_s12 + $0x8] sm:$0xff]  ;;  %v1214_v1 = vld [vmem:[%s228_s12] sm:$0xff]  ;;  %s1076_s13 = smov 90   ;;  %s1077_s14 = smov 91   ;;  %v1079_v3 = vmov 0.0  }
  0x2b   : > { %376 = vrot.lane.b32.xlu0 %v1212_v0, %s1076_s13  ;;  %374 = vrot.lane.b32.xlu1 %v1214_v1, %s1076_s13  ;;  %v1218_v2 = vld [vmem:[%s228_s12 + $0x10] sm:$0xff]  ;;  %s1078_s30 = smov 92   ;;  %s1080_s15 = smov 108   ;;  %v264_v4 = vld [vmem:[%s228_s12 + $0x18] sm:$0xff]  ;;  %vm1085_vm0 = vmmov 0   ;;  %v1086_v5 = vmov 0  }
  0x2c   : > { %856 = vmatprep.subr.mxu1 %v1079_v3  ;;  %464 = vmatprep.mubr.f32.mxu0 %v1079_v3  ;;  %s1081_s16 = smov 109   ;;  %s1082_s17 = smov 110   ;;  %v390_v6 = vld [vmem:[%s1348_s2] sm:$0x3f]  ;;  %vm382_vm1 = vcmask 736256   ;;  %vm367_vm2 = vcmask 744448  }
  0x2d   : > { %s1083_s24 = smov 126   ;;  %s1084_s25 = smov 127   ;;  %874 = vmatprep.mubr.msk.f32.mxu1 %vm1085_vm0, %v1079_v3  ;;  %957 = vset.pattern.permute.xlu0 %v1086_v5  ;;  %vm352_vm3 = vcmask 752640   ;;  %vm337_vm4 = vcmask 883712   ;;  %vm322_vm5 = vcmask 891904   ;;  %vm307_vm6 = vcmask 900096  }
  0x2e   : > { %958 = vset.pattern.permute.xlu1 %v1086_v5  ;;  %vm292_vm7 = vcmask 1031168   ;;  %vm277_vm8 = vcmask 1039360   ;;  %v389_v55 = vld [vmem:[%s1347_s1] sm:$0x3f]  ;;  %vm396_vm9 = vcmask 588800   ;;  %vm567_vm10 = vcmask 1045504  }
  0x2f   : > { %378 = vrot.lane.b32.xlu0 %v1218_v2, %s1076_s13  ;;  %361 = vrot.lane.b32.xlu1 %v1212_v0, %s1077_s14  ;;  %vm563_vm11 = vcmask 48128   ;;  %s725_s29 = scalar_lea.sflag [#allocation4], %s1204_s28 }
  0x33   : > { %363 = vrot.lane.b32.xlu0 %v1218_v2, %s1077_s14  ;;  %359 = vrot.lane.b32.xlu1 %v1214_v1, %s1077_s14 }
  0x37   : > { %346 = vrot.lane.b32.xlu0 %v1212_v0, %s1078_s30  ;;  %348 = vrot.lane.b32.xlu1 %v1218_v2, %s1078_s30 }
  0x3b   : > { %344 = vrot.lane.b32.xlu0 %v1214_v1, %s1078_s30  ;;  %331 = vrot.lane.b32.xlu1 %v1212_v0, %s1080_s15 }
  0x3f   : > { %333 = vrot.lane.b32.xlu0 %v1218_v2, %s1080_s15  ;;  %329 = vrot.lane.b32.xlu1 %v1214_v1, %s1080_s15 }
  0x43   : > { %316 = vrot.lane.b32.xlu0 %v1212_v0, %s1081_s16  ;;  %318 = vrot.lane.b32.xlu1 %v1218_v2, %s1081_s16 }
  0x47   : > { %380 = vrot.lane.b32.xlu0 %v264_v4, %s1076_s13  ;;  %314 = vrot.lane.b32.xlu1 %v1214_v1, %s1081_s16 }
  0x4b   : > { %301 = vrot.lane.b32.xlu0 %v1212_v0, %s1082_s17  ;;  %303 = vrot.lane.b32.xlu1 %v1218_v2, %s1082_s17 }
  0x4f   : > { %365 = vrot.lane.b32.xlu0 %v264_v4, %s1077_s14  ;;  %299 = vrot.lane.b32.xlu1 %v1214_v1, %s1082_s17 }
  0x53   : > { %286 = vrot.lane.b32.xlu0 %v1212_v0, %s1083_s24  ;;  %288 = vrot.lane.b32.xlu1 %v1218_v2, %s1083_s24 }
  0x57   : > { %350 = vrot.lane.b32.xlu0 %v264_v4, %s1078_s30  ;;  %284 = vrot.lane.b32.xlu1 %v1214_v1, %s1083_s24  ;;  %s882_s30 = smul.u32 12, %s1204_s28 }
  0x5b   : > { %271 = vrot.lane.b32.xlu0 %v1212_v0, %s1084_s25  ;;  %273 = vrot.lane.b32.xlu1 %v1218_v2, %s1084_s25 }
  0x5f   : > { %335 = vrot.lane.b32.xlu0 %v264_v4, %s1080_s15  ;;  %269 = vrot.lane.b32.xlu1 %v1214_v1, %s1084_s25  ;;  %s883_s15 = smul.u32 192, %s1065_s21  ;;  %s1087_s21 = smov [#allocation5]  }
  0x60   : > { %s997_s9 = sshll.u32 %s1087_s21, 4  ;;  %s998_s9 = int_to_ptr.vmem [resolvable:$false] %s997_s9 }
  0x61   : > { %s1304_s27 = scalar_lea.hbm %s1351_s5, %s883_s15  ;;  %s999_s11 = scalar_lea.vmem %s998_s9, 384 }
  0x63   : > { %320 = vrot.lane.b32.xlu0 %v264_v4, %s1081_s16  ;;  %305 = vrot.lane.b32.xlu1 %v264_v4, %s1082_s17  ;;  %s254_s16 = scalar_lea.vmem [#allocation5], %s882_s30 }
  0x64   : > { %s741_s17 = sshll.u32 %s254_s16, 4  ;;  %s742_s17 = int_to_ptr.vmem [resolvable:$true] %s741_s17 }
  0x65   : > { %s993_s10 = scalar_lea.vmem %s742_s17, 192  ;;  %p1000_p0 = scmp.lt.s32.totalorder %s742_s17, %s998_s9 }
  0x66   : > { %p994_p8 = scmp.ne.s32.totalorder %s742_s17, %s993_s10  ;;  %p1001_p1 = scmp.lt.s32.totalorder %s999_s11, %s993_s10 }
  0x67   : > { %290 = vrot.lane.b32.xlu0 %v264_v4, %s1083_s24  ;;  %275 = vrot.lane.b32.xlu1 %v264_v4, %s1084_s25 }
  0x68   : > { %p995_p11 = pnand %p994_p8, %p1169_p9  ;;  %p1002_p2 = por %p1001_p1, %p1000_p0 }
  0x6a   : > { %p996_p12 = pneg %p995_p11 }
  0x6b   : > { %393 = vperm.xlu0 %957, %v390_v6  }
  0x6c   : > { %p1003_p3 = pnand %p1002_p2, %p996_p12 }
  0x9d   : > { %v377_v7 = vpop.permute.xlu0 %376  ;;  %v375_v8 = vpop.permute.xlu1 %374 }
  0x9e   : > { %v383_v12 = vsel %vm382_vm1, %v375_v8, %v377_v7 }
  0xa1   : > { %v379_v9 = vpop.permute.xlu0 %378  ;;  %v362_v10 = vpop.permute.xlu1 %361 }
  0xa2   : > { %v384_v11 = vsel %vm382_vm1, %v377_v7, %v379_v9 }
  0xa3   : > { %414 = vmatprep.subr.mxu0 %v384_v11 }
  0xa4   : > { %415 = vmatpush1.msra.mxu0 %v383_v12 }
  0xa5   : > { %v364_v13 = vpop.permute.xlu0 %363  ;;  %v360_v14 = vpop.permute.xlu1 %359 }
  0xa6   : > { %v369_v15 = vsel %vm367_vm2, %v362_v10, %v364_v13  ;;  %v368_v16 = vsel %vm367_vm2, %v360_v14, %v362_v10 }
  0xa7   : > { %416 = vmatprep.subr.mxu0 %v369_v15 }
  0xa8   : > { %417 = vmatpush1.msra.mxu0 %v368_v16 }
  0xa9   : > { %v347_v17 = vpop.permute.xlu0 %346  ;;  %v349_v18 = vpop.permute.xlu1 %348 }
  0xaa   : > { %v354_v19 = vsel %vm352_vm3, %v347_v17, %v349_v18 }
  0xab   : > { %418 = vmatprep.subr.mxu0 %v354_v19 }
  0xad   : > { %v345_v20 = vpop.permute.xlu0 %344  ;;  %v332_v21 = vpop.permute.xlu1 %331 }
  0xae   : > { %v353_v22 = vsel %vm352_vm3, %v345_v20, %v347_v17  ;;  %v556_v20 = vld [vmem:[%s1349_s3] sm:$0xf] }
  0xaf   : > { %419 = vmatpush1.msra.mxu0 %v353_v22 }
  0xb1   : > { %v334_v23 = vpop.permute.xlu0 %333  ;;  %v330_v24 = vpop.permute.xlu1 %329 }
  0xb2   : > { %v339_v25 = vsel %vm337_vm4, %v332_v21, %v334_v23  ;;  %v338_v26 = vsel %vm337_vm4, %v330_v24, %v332_v21 }
  0xb3   : > { %420 = vmatprep.subr.mxu0 %v339_v25 }
  0xb4   : > { %421 = vmatpush1.msra.mxu0 %v338_v26 }
  0xb5   : > { %v317_v27 = vpop.permute.xlu0 %316  ;;  %v319_v28 = vpop.permute.xlu1 %318 }
  0xb6   : > { %v324_v29 = vsel %vm322_vm5, %v317_v27, %v319_v28 }
  0xb7   : > { %422 = vmatprep.subr.mxu0 %v324_v29 }
  0xb9   : > { %v381_v30 = vpop.permute.xlu0 %380  ;;  %v315_v31 = vpop.permute.xlu1 %314 }
  0xba   : > { %v323_v32 = vsel %vm322_vm5, %v315_v31, %v317_v27  ;;  %v385_v33 = vsel %vm382_vm1, %v379_v9, %v381_v30 }
  0xbb   : > { %423 = vmatpush1.msra.mxu0 %v323_v32  ;;  %857 = vmatpush3.msra.mxu1 %v385_v33 }
  0xbc   : > { %858 = vmatprep.subr.mxu1 %v1079_v3 }
  0xbd   : > { %v302_v34 = vpop.permute.xlu0 %301  ;;  %v304_v35 = vpop.permute.xlu1 %303 }
  0xbe   : > { %v309_v36 = vsel %vm307_vm6, %v302_v34, %v304_v35 }
  0xbf   : > { %424 = vmatprep.subr.mxu0 %v309_v36 }
  0xc1   : > { %v366_v37 = vpop.permute.xlu0 %365  ;;  %v300_v38 = vpop.permute.xlu1 %299 }
  0xc2   : > { %v308_v39 = vsel %vm307_vm6, %v300_v38, %v302_v34  ;;  %v370_v40 = vsel %vm367_vm2, %v364_v13, %v366_v37 }
  0xc3   : > { %425 = vmatpush1.msra.mxu0 %v308_v39  ;;  %859 = vmatpush3.msra.mxu1 %v370_v40 }
  0xc4   : > { %860 = vmatprep.subr.mxu1 %v1079_v3 }
  0xc5   : > { %v287_v41 = vpop.permute.xlu0 %286  ;;  %v289_v42 = vpop.permute.xlu1 %288 }
  0xc6   : > { %v294_v43 = vsel %vm292_vm7, %v287_v41, %v289_v42 }
  0xc7   : > { %426 = vmatprep.subr.mxu0 %v294_v43 }
  0xc9   : > { %v351_v44 = vpop.permute.xlu0 %350  ;;  %v285_v45 = vpop.permute.xlu1 %284 }
  0xca   : > { %v293_v46 = vsel %vm292_vm7, %v285_v45, %v287_v41  ;;  %v355_v47 = vsel %vm352_vm3, %v349_v18, %v351_v44 }
  0xcb   : > { %427 = vmatpush1.msra.mxu0 %v293_v46  ;;  %861 = vmatpush3.msra.mxu1 %v355_v47 }
  0xcc   : > { %862 = vmatprep.subr.mxu1 %v1079_v3 }
  0xcd   : > { %v272_v48 = vpop.permute.xlu0 %271  ;;  %v274_v49 = vpop.permute.xlu1 %273 }
  0xce   : > { %v279_v50 = vsel %vm277_vm8, %v272_v48, %v274_v49 }
  0xcf   : > { %428 = vmatprep.subr.mxu0 %v279_v50 }
  0xd1   : > { %v336_v51 = vpop.permute.xlu0 %335  ;;  %v270_v52 = vpop.permute.xlu1 %269 }
  0xd2   : > { %v278_v53 = vsel %vm277_vm8, %v270_v52, %v272_v48  ;;  %v340_v54 = vsel %vm337_vm4, %v334_v23, %v336_v51 }
  0xd3   : > { %429 = vmatpush1.msra.mxu0 %v278_v53  ;;  %863 = vmatpush3.msra.mxu1 %v340_v54 }
  0xd4   : > { %430 = vmatprep.subr.mxu0 %v1212_v0  ;;  %864 = vmatprep.subr.mxu1 %v1079_v3  ;;  %v557_v0 = vld [vmem:[%s1350_s4] sm:$0xf] }
  0xd5   : > { %v321_v56 = vpop.permute.xlu0 %320  ;;  %431 = vmatpush1.msra.mxu0 %v1214_v1  ;;  %v306_v57 = vpop.permute.xlu1 %305  ;;  %560 = vperm.xlu1 %958, %v557_v0  }
  0xd6   : > { %833 = vmatmul.mubr.msk.f32.vlgmr.msra.gmra.mxu0 %vm396_vm9, %v389_v55  ;;  %v325_v58 = vsel %vm322_vm5, %v319_v28, %v321_v56  ;;  %v310_v59 = vsel %vm307_vm6, %v304_v35, %v306_v57 }
  0xd7   : > { %865 = vmatpush3.msra.mxu1 %v325_v58  ;;  %641 = vmatprep.mubr.f32.mxu0 %v1079_v3 }
  0xd8   : > { %866 = vmatprep.subr.mxu1 %v1079_v3 }
  0xd9   : > { %v291_v60 = vpop.permute.xlu0 %290  ;;  %867 = vmatpush3.msra.mxu1 %v310_v59  ;;  %v276_v61 = vpop.permute.xlu1 %275 }
  0xda   : > { %868 = vmatprep.subr.mxu1 %v1079_v3  ;;  %v295_v62 = vsel %vm292_vm7, %v289_v42, %v291_v60  ;;  %v280_v63 = vsel %vm277_vm8, %v274_v49, %v276_v61 }
  0xdb   : > { %869 = vmatpush3.msra.mxu1 %v295_v62 }
  0xdc   : > { %870 = vmatprep.subr.mxu1 %v1079_v3 }
  0xdd   : > { %871 = vmatpush3.msra.mxu1 %v280_v63 }
  0xde   : > { %872 = vmatprep.subr.mxu1 %v1079_v3 }
  0xdf   : > { %873 = vmatpush3.msra.mxu1 %v1218_v2 }
  0xe0   : > { %875 = vmatmul.mubr.msk.f32.vlgmr.msra.gmra.mxu1 %vm396_vm9, %v389_v55  ;;  %877 = vmatprep.subr.mxu1 %v1079_v3 }
  0xe1   : > { %879 = vmatprep.mubr.msk.f32.mxu1 %vm1085_vm0, %v1079_v3 }
  0xe6   : > { %v394_v1 = vpop.permute.xlu0 %393 }
 0x150   : > { %v561_v25 = vpop.permute.xlu1 %560 }
 0x196   : > { %v466_v4 = vpop.f32.mrf.mxu0 }
 0x197   : > { %v467_v5 = vadd.f32 %v466_v4, %v394_v1 }
 0x198   : > { %v468_v6 = vpop.f32.mrf.mxu0 }
 0x199   : > { %v544_v7 = vmul.f32 0.70710677, %v467_v5  ;;  %v469_v8 = vadd.f32 %v468_v6, %v394_v1  ;;  %v541_v17 = vmul.f32 0.5, %v467_v5 }
 0x19b   : > { %959 = verf.f32 %v544_v7  ;;  %v545_v2 = vmul.f32 0.70710677, %v469_v8  ;;  %v542_v15 = vmul.f32 0.5, %v469_v8 }
 0x19d   : > { %961 = verf.f32 %v545_v2 }
 0x1a0   : > { %v537_v9 = vpop.f32.mrf.mxu1 }
 0x1a1   : > { %v538_v10 = vadd.f32 %v537_v9, %v394_v1 }
 0x1a2   : > { %v876_v11 = vpop.f32.mrf.mxu1 }
 0x1a3   : > { %v546_v12 = vmul.f32 0.70710677, %v538_v10  ;;  %v543_v22 = vmul.f32 0.5, %v538_v10 }
 0x1a5   : > { %963 = verf.f32 %v546_v12 }
 0x1a8   : > { %v960_v3 = vpop.eup %959 }
 0x1a9   : > { %v550_v14 = vadd.f32 1.0, %v960_v3 }
 0x1aa   : > { %v962_v13 = vpop.eup %961 }
 0x1ab   : > { %v551_v16 = vadd.f32 1.0, %v962_v13  ;;  %v553_v19 = vmul.f32 %v550_v14, %v541_v17 }
 0x1ad   : > { %v554_v18 = vmul.f32 %v551_v16, %v542_v15 }
 0x1af   : > { %835 = vmatprep.subr.msk.mxu0 %vm567_vm10, %v554_v18 }
 0x1b0   : > { %836 = vmatpush1.msk.msra.mxu0 %vm567_vm10, %v553_v19 }
 0x1b1   : > { %837 = vmatmul.mubr.msk.f32.vlgmr.msra.gmra.mxu0 %vm563_vm11, %v556_v20 }
 0x1b2   : > { %v964_v21 = vpop.eup %963 }
 0x1b3   : > { %v552_v23 = vadd.f32 1.0, %v964_v21 }
 0x1b5   : > { %v555_v24 = vmul.f32 %v552_v23, %v543_v22 }
 0x1b7   : > { %878 = vmatpush3.msk.msra.mxu1 %vm567_vm10, %v555_v24 }
 0x1b8   : > { %880 = vmatmul.mubr.msk.f32.vlgmr.msra.gmra.mxu1 %vm563_vm11, %v556_v20 }
 0x271   : > { %v643_v26 = vpop.f32.mrf.mxu0 }
 0x272   : > { %v644_v27 = vadd.f32 %v643_v26, %v561_v25 }
 0x273   : > { %v645_v28 = vpop.f32.mrf.mxu0 }
 0x274   : > { %v646_v29 = vadd.f32 %v645_v28, %v561_v25 }
 0x276   : > { %v720_v30 = vcombine.low %v644_v27, %v646_v29 }
 0x278   : > { %v714_v31 = vpop.f32.mrf.mxu1  ;;  %722 = vst [vmem:[%s254_s16] sm:$0xff] %v720_v30 }
 0x279   : > { %v715_v32 = vadd.f32 %v714_v31, %v561_v25 }
 0x27a   : > { %v881_v33 = vpop.f32.mrf.mxu1 }
 0x27b   : > { %723 = vst [vmem:[%s254_s16 + $0x8] sm:$0xf] %v715_v32 }
 0x27c   : > { %1006 = shalt.err (!%p1003_p3)
}
 0x27d   : > { %s1007_s12 = scalar_lea.hbm %s1304_s27, 192  ;;  %s1011_s14 = scalar_lea.hbm %s1351_s5, 384 }
 0x27e   : > { %p1008_p5 = scmp.ne.s32.totalorder %s1304_s27, %s1007_s12  ;;  %p1012_p10 = scmp.lt.s32.totalorder %s1304_s27, %s1351_s5 }
 0x27f   : > { %p1013_p4 = scmp.lt.s32.totalorder %s1011_s14, %s1007_s12 }
 0x280   : > { %p1009_p6 = pnand %p1008_p5, %p1169_p9 }
 0x281   : > { %p1014_p13 = por %p1013_p4, %p1012_p10 }
 0x282   : > { %p1010_p7 = pneg %p1009_p6 }
 0x284   : > { %p1015_p8 = pnand %p1014_p13, %p1010_p7 }
 0x286   : > { %1018 = shalt.err (!%p1015_p8)
}
 0x287   : > { %886 = dma.vmem_to_hbm [thread:$0]  (%p1169_p9), %s742_s17, 192, %s1304_s27, %s725_s29  }
 0x288 PF: > { %s753_s16 = sand.u32 1, %s1053_s18   ;;  %p1357_p11 = scmp.ne.s32.totalorder %s1355_s8, 0 }
 0x289   : > { %p1358_p12 = scmp.ge.s32.totalorder %s1073_s23, 2  ;;  %s754_s24 = scalar_lea.sflag [#allocation4], %s753_s16 }
 0x28b   : > { %p893_p0 = pnand %p1358_p12, %p1357_p11 }
 0x28d   : > { %p894_p1 = pneg %p893_p0 }
 0x28f   : > { %1048 = dma.done.wait (%p894_p1), %s754_s24, 192  }
 0x290   : > { %1050 = vsyncadd (%p894_p1), %s754_s24, 4294967104  ;;  %s21_s23 = sadd.s32 1, %s1073_s23   ;;  %s1359_s18 = smov %s1057_s19 }
 0x291   : > { %p18_p2 = scmp.ge.s32.totalorder %s21_s23, 4   ;;  %s1360_s19 = smov %s1061_s20 }
 0x292   : > { %s1361_s20 = smov %s1174_s7  ;;  %s1362_s21 = smov %s1069_s22 }
 0x293   : > { %s1363_s22 = smov %s1365_s26  ;;  %20 = sbr.rel (!%p18_p2) target bundleno = 6 (0x6), region = 86 }
 0x298   :  { %759 = vsyncpa [#allocation3], 1 }
 0x299   :  { %761 = vsyncpa [#allocation3 + $0x1], 1 }
 0x29a   :  { %762 = vsyncpa [#allocation4], 1 }
 0x29b   :  { %764 = vsyncpa [#allocation4 + $0x1], 1 }

</bundles_post_ra>
